<compile_context>
chip_gen: v7x
topology: tpu7x:2x2x1
jax: 0.10.0
libtpu: 0.0.40
codegen_flags: <defaults>
</compile_context>

<pallas_src>
import math

import jax
import jax.numpy as jnp
from jax.experimental import pallas as pl
from jax.experimental.pallas import tpu as pltpu

_EPS = 1e-5
_MAX_TILE_ROWS = 8192
_MAX_PACK_LANES = 1024      # cap packed width g*C at 8 f32 vregs per row
_MAX_PACK_GROUPS = 16       # cap static unroll of the per-segment loop


def _tpu_budget():
    """(max_block_bytes_f32, vmem_limit_bytes) sized to this generation's VMEM."""
    try:
        cap = pltpu.get_tpu_info().vmem_capacity_bytes
    except Exception:
        cap = 64 << 20                      # be conservative if query fails
    if cap >= (96 << 20):                   # v5e / v6e: 128 MiB VMEM
        return 8 << 20, 96 << 20
    return 4 << 20, 48 << 20                # v7x: 64 MiB physical VMEM


def _make_kernel(c: int, g: int):
    """LayerNorm over a (tile_rows, g*c) block.

    Each lane row packs `g` logical rows of `c` channels; segment r occupies
    lanes [r*c, (r+1)*c). Two-pass (mean-subtracted) variance in f32, then a
    single full-width normalize + scale pass and one lane-dense store.
    """
    inv_c = 1.0 / c

    def kernel(x_ref, w_ref, o_ref):
        x = x_ref[...].astype(jnp.float32)               # (TR, g*c)
        w = w_ref[...].astype(jnp.float32)               # (1,  g*c)
        if g == 1:
            mean = jnp.sum(x, axis=-1, keepdims=True) * inv_c
            xc = x - mean                                # two-pass variance (stable)
            var = jnp.sum(xc * xc, axis=-1, keepdims=True) * inv_c
            inv = jax.lax.rsqrt(var + _EPS)              # EUP slot
            o_ref[...] = (x * inv * w).astype(o_ref.dtype)
        else:
            tr = x.shape[0]
            inv_cols = []
            for r in range(g):                           # static unroll, g <= 16
                xs = x[:, r * c:(r + 1) * c]             # (TR, c)
                mean = jnp.sum(xs, axis=-1, keepdims=True) * inv_c
                xc = xs - mean
                var = jnp.sum(xc * xc, axis=-1, keepdims=True) * inv_c
                inv = jax.lax.rsqrt(var + _EPS)          # (TR, 1), EUP slot
                inv_cols.append(jnp.broadcast_to(inv, (tr, c)))
            inv_full = jnp.concatenate(inv_cols, axis=-1)        # (TR, g*c)
            o_ref[...] = (x * inv_full * w).astype(o_ref.dtype)  # one lane-dense store

    return kernel


def _round_tile_rows(tr: int, rows_eff: int, sub: int) -> int:
    tr = max(sub, (tr // sub) * sub)        # align to the dtype's sublane packing
    if tr >= rows_eff:
        return rows_eff                     # full-extent block (always legal)
    return tr


def _choose_tile_rows(rows_eff: int, c_eff: int, max_block_bytes: int, sub: int) -> int:
    # Size by the in-kernel f32 working set, not the input itemsize.
    row_bytes = c_eff * 4
    tr = max(sub, max_block_bytes // row_bytes)
    # Never let the grid collapse to 1 (or a couple of steps) for non-tiny
    # tensors: megacore sharding + pipelining need several grid steps.
    total_bytes = rows_eff * row_bytes
    if total_bytes >= (8 << 20):
        tr = min(tr, pl.cdiv(rows_eff, 8))
    elif total_bytes >= (2 << 20):
        tr = min(tr, pl.cdiv(rows_eff, 4))
    tr = min(tr, _MAX_TILE_ROWS)
    return _round_tile_rows(tr, rows_eff, sub)


def _plain_layernorm(x2, weight):
    """Tiny plain-XLA path for the < g leftover logical rows."""
    xf = x2.astype(jnp.float32)
    mean = jnp.mean(xf, axis=-1, keepdims=True)
    var = jnp.mean(jnp.square(xf - mean), axis=-1, keepdims=True)
    out = xf * jax.lax.rsqrt(var + _EPS) * weight.astype(jnp.float32)
    return out.astype(x2.dtype)


def biasfree_layernorm(x, weight, *, tile_rows=None):
    """x: (..., C); weight: (C,). Matches BiasFree_LayerNorm.forward."""
    orig_shape = x.shape
    c = int(orig_shape[-1])
    rows = 1
    for d in orig_shape[:-1]:
        rows *= int(d)
    if rows == 0 or c == 0:
        return x

    itemsize = jnp.dtype(x.dtype).itemsize
    sub = max(8, 32 // itemsize)            # sublane packing: f32=8, bf16=16, i8/fp8=32
    max_block_bytes, vmem_limit = _tpu_budget()

    # Lane-dense packing: fold g consecutive logical rows into one lane row
    # (a free, row-major reshape) so the packed width g*C is a multiple of 128.
    g = 1
    if c % 128 != 0:
        cand = math.lcm(c, 128) // c
        if cand <= _MAX_PACK_GROUPS and cand * c <= _MAX_PACK_LANES and rows >= cand:
            g = cand

    x_flat = x.reshape(rows, c)
    rem = rows % g
    rows_main = rows - rem
    x_main = x_flat if rem == 0 else x_flat[:rows_main]

    rows_eff = rows_main // g
    c_eff = g * c
    x2 = x_main.reshape(rows_eff, c_eff)                 # free row-major reshape
    w2 = weight.reshape(1, c)
    if g > 1:
        w2 = jnp.tile(w2, (1, g))                        # (1, g*c), tiny

    if tile_rows is None:
        tile_rows = _choose_tile_rows(rows_eff, c_eff, max_block_bytes, sub)
    else:
        tile_rows = _round_tile_rows(int(tile_rows), rows_eff, sub)

    grid = (pl.cdiv(rows_eff, tile_rows),)               # ragged last block is masked

    cost = pl.CostEstimate(
        flops=7 * rows_eff * c_eff,
        transcendentals=rows_main,                       # one rsqrt per logical row
        bytes_accessed=2 * rows_eff * c_eff * itemsize + c_eff * 4,
    )

    out_main = pl.pallas_call(
        _make_kernel(c, g),
        out_shape=jax.ShapeDtypeStruct((rows_eff, c_eff), x.dtype),
        grid_spec=pltpu.PrefetchScalarGridSpec(
            num_scalar_prefetch=0,
            grid=grid,
            in_specs=[
                pl.BlockSpec((tile_rows, c_eff), lambda i: (i, 0)),
                pl.BlockSpec((1, c_eff), lambda i: (0, 0)),   # weight stays resident
            ],
            out_specs=pl.BlockSpec((tile_rows, c_eff), lambda i: (i, 0)),
        ),
        compiler_params=pltpu.CompilerParams(
            dimension_semantics=("parallel",),           # megacore-shards on v7x
            vmem_limit_bytes=vmem_limit),
        cost_estimate=cost,
    )(x2, w2)

    out_flat = out_main.reshape(rows_main, c)
    if rem:
        # The < g leftover logical rows take a tiny plain-XLA path; the bulk of
        # the tensor stays lane-dense (this costs one extra copy only when
        # rows % g != 0, which is the rare case).
        out_tail = _plain_layernorm(x_flat[rows_main:], weight)
        out_flat = jnp.concatenate([out_flat, out_tail], axis=0)
    return out_flat.reshape(orig_shape)


def _reference(x, weight):
    xf = x.astype(jnp.float32)
    sigma = jnp.var(xf, axis=-1, keepdims=True)          # unbiased=False
    out = xf / jnp.sqrt(sigma + _EPS) * weight.astype(jnp.float32)
    return out.astype(x.dtype)


if __name__ == "__main__":
    keys = jax.random.split(jax.random.PRNGKey(0), 10)

    def check(x, w, *, tol=1e-4, **kw):
        out = jax.block_until_ready(biasfree_layernorm(x, w, **kw))
        assert out.shape == x.shape and out.dtype == x.dtype
        ref = _reference(x, w)
        assert jnp.allclose(out, ref, atol=tol, rtol=tol), \
            float(jnp.max(jnp.abs(out.astype(jnp.float32) - ref.astype(jnp.float32))))

    # 1) C=48 -> packed g=8 (384 lanes), rows divisible by g, multi-step grid,
    #    shifted mean to exercise the two-pass variance.
    x = jax.random.normal(keys[0], (2, 64, 48), dtype=jnp.float32) + 3.0
    w = 1.0 + 0.1 * jax.random.normal(keys[1], (48,), dtype=jnp.float32)
    check(x, w, tile_rows=8)

    # 2) C=32 -> packed g=4 (128 lanes) with 2 leftover logical rows (tail path).
    x = jax.random.normal(keys[2], (2, 67, 32), dtype=jnp.float32)
    w = 1.0 + 0.1 * jax.random.normal(keys[3], (32,), dtype=jnp.float32)
    check(x, w)

    # 3) C=160 (not a divisor of 128) -> packed g=4 (640 lanes), lane-dense.
    x = jax.random.normal(keys[4], (2, 8, 160), dtype=jnp.float32)
    w = 1.0 + 0.1 * jax.random.normal(keys[5], (160,), dtype=jnp.float32)
    check(x, w)

    # 4) C=100 -> packing capped out, general g=1 path (full-extent last dim).
    x = jax.random.normal(keys[6], (3, 10, 100), dtype=jnp.float32)
    w = 1.0 + 0.1 * jax.random.normal(keys[7], (100,), dtype=jnp.float32)
    check(x, w)

    # 5) bf16 input: sublane packing of 16, f32 accumulation inside the kernel.
    x = jax.random.normal(keys[8], (2, 32, 96), dtype=jnp.bfloat16)
    w = (1.0 + 0.1 * jax.random.normal(keys[9], (96,), dtype=jnp.float32)).astype(jnp.bfloat16)
    check(x, w, tol=2e-2, tile_rows=16)

    print("KERNEL_OK")
</pallas_src>

<mosaic_0001>
module attributes {stable_mosaic.version = 11 : i64} {
  func.func @kernel(%arg0: i32, %arg1: memref<8x384xf32, #tpu.memory_space<vmem>>, %arg2: memref<1x384xf32, #tpu.memory_space<vmem>>, %arg3: memref<8x384xf32, #tpu.memory_space<vmem>>) attributes {dimension_semantics = [#tpu.dimension_semantics<parallel>], iteration_bounds = array<i64: 2>, scalar_prefetch = 0 : i64, scratch_operands = 0 : i64, tpu.core_type = #tpu.core_type<tc>, window_params = [{transform_indices = @transform_0, window_bounds = array<i64: 8, 384>}, {pipeline_mode = #tpu.pipeline_mode<synchronous>, transform_indices = @transform_1, window_bounds = array<i64: 1, 384>}, {transform_indices = @transform_2, window_bounds = array<i64: 8, 384>}]} {
    %c0 = arith.constant 0 : index
    %c0_0 = arith.constant 0 : index
    %0 = vector.load %arg1[%c0, %c0_0] : memref<8x384xf32, #tpu.memory_space<vmem>>, vector<8x384xf32>
    %c0_1 = arith.constant 0 : index
    %c0_2 = arith.constant 0 : index
    %1 = vector.load %arg2[%c0_1, %c0_2] : memref<1x384xf32, #tpu.memory_space<vmem>>, vector<1x384xf32>
    %2 = vector.extract_strided_slice %0 {offsets = [0, 0], sizes = [8, 48], strides = [1, 1]} : vector<8x384xf32> to vector<8x48xf32>
    %cst = arith.constant dense<0.000000e+00> : vector<8xf32>
    %3 = vector.multi_reduction <add>, %2, %cst [1] : vector<8x48xf32> to vector<8xf32>
    %4 = vector.shape_cast %3 : vector<8xf32> to vector<8x1xf32>
    %cst_3 = arith.constant 0.020833334 : f32
    %5 = vector.broadcast %cst_3 : f32 to vector<8x1xf32>
    %6 = arith.mulf %4, %5 : vector<8x1xf32>
    %7 = vector.broadcast %6 : vector<8x1xf32> to vector<8x48xf32>
    %8 = arith.subf %2, %7 : vector<8x48xf32>
    %9 = arith.mulf %8, %8 : vector<8x48xf32>
    %cst_4 = arith.constant dense<0.000000e+00> : vector<8xf32>
    %10 = vector.multi_reduction <add>, %9, %cst_4 [1] : vector<8x48xf32> to vector<8xf32>
    %11 = vector.shape_cast %10 : vector<8xf32> to vector<8x1xf32>
    %cst_5 = arith.constant 0.020833334 : f32
    %12 = vector.broadcast %cst_5 : f32 to vector<8x1xf32>
    %13 = arith.mulf %11, %12 : vector<8x1xf32>
    %cst_6 = arith.constant 9.99999974E-6 : f32
    %14 = vector.broadcast %cst_6 : f32 to vector<8x1xf32>
    %15 = arith.addf %13, %14 : vector<8x1xf32>
    %16 = math.rsqrt %15 : vector<8x1xf32>
    %17 = vector.shape_cast %16 : vector<8x1xf32> to vector<8x1xf32>
    %18 = vector.broadcast %17 : vector<8x1xf32> to vector<8x48xf32>
    %19 = vector.extract_strided_slice %0 {offsets = [0, 48], sizes = [8, 48], strides = [1, 1]} : vector<8x384xf32> to vector<8x48xf32>
    %cst_7 = arith.constant dense<0.000000e+00> : vector<8xf32>
    %20 = vector.multi_reduction <add>, %19, %cst_7 [1] : vector<8x48xf32> to vector<8xf32>
    %21 = vector.shape_cast %20 : vector<8xf32> to vector<8x1xf32>
    %cst_8 = arith.constant 0.020833334 : f32
    %22 = vector.broadcast %cst_8 : f32 to vector<8x1xf32>
    %23 = arith.mulf %21, %22 : vector<8x1xf32>
    %24 = vector.broadcast %23 : vector<8x1xf32> to vector<8x48xf32>
    %25 = arith.subf %19, %24 : vector<8x48xf32>
    %26 = arith.mulf %25, %25 : vector<8x48xf32>
    %cst_9 = arith.constant dense<0.000000e+00> : vector<8xf32>
    %27 = vector.multi_reduction <add>, %26, %cst_9 [1] : vector<8x48xf32> to vector<8xf32>
    %28 = vector.shape_cast %27 : vector<8xf32> to vector<8x1xf32>
    %cst_10 = arith.constant 0.020833334 : f32
    %29 = vector.broadcast %cst_10 : f32 to vector<8x1xf32>
    %30 = arith.mulf %28, %29 : vector<8x1xf32>
    %cst_11 = arith.constant 9.99999974E-6 : f32
    %31 = vector.broadcast %cst_11 : f32 to vector<8x1xf32>
    %32 = arith.addf %30, %31 : vector<8x1xf32>
    %33 = math.rsqrt %32 : vector<8x1xf32>
    %34 = vector.shape_cast %33 : vector<8x1xf32> to vector<8x1xf32>
    %35 = vector.broadcast %34 : vector<8x1xf32> to vector<8x48xf32>
    %36 = vector.extract_strided_slice %0 {offsets = [0, 96], sizes = [8, 48], strides = [1, 1]} : vector<8x384xf32> to vector<8x48xf32>
    %cst_12 = arith.constant dense<0.000000e+00> : vector<8xf32>
    %37 = vector.multi_reduction <add>, %36, %cst_12 [1] : vector<8x48xf32> to vector<8xf32>
    %38 = vector.shape_cast %37 : vector<8xf32> to vector<8x1xf32>
    %cst_13 = arith.constant 0.020833334 : f32
    %39 = vector.broadcast %cst_13 : f32 to vector<8x1xf32>
    %40 = arith.mulf %38, %39 : vector<8x1xf32>
    %41 = vector.broadcast %40 : vector<8x1xf32> to vector<8x48xf32>
    %42 = arith.subf %36, %41 : vector<8x48xf32>
    %43 = arith.mulf %42, %42 : vector<8x48xf32>
    %cst_14 = arith.constant dense<0.000000e+00> : vector<8xf32>
    %44 = vector.multi_reduction <add>, %43, %cst_14 [1] : vector<8x48xf32> to vector<8xf32>
    %45 = vector.shape_cast %44 : vector<8xf32> to vector<8x1xf32>
    %cst_15 = arith.constant 0.020833334 : f32
    %46 = vector.broadcast %cst_15 : f32 to vector<8x1xf32>
    %47 = arith.mulf %45, %46 : vector<8x1xf32>
    %cst_16 = arith.constant 9.99999974E-6 : f32
    %48 = vector.broadcast %cst_16 : f32 to vector<8x1xf32>
    %49 = arith.addf %47, %48 : vector<8x1xf32>
    %50 = math.rsqrt %49 : vector<8x1xf32>
    %51 = vector.shape_cast %50 : vector<8x1xf32> to vector<8x1xf32>
    %52 = vector.broadcast %51 : vector<8x1xf32> to vector<8x48xf32>
    %53 = vector.extract_strided_slice %0 {offsets = [0, 144], sizes = [8, 48], strides = [1, 1]} : vector<8x384xf32> to vector<8x48xf32>
    %cst_17 = arith.constant dense<0.000000e+00> : vector<8xf32>
    %54 = vector.multi_reduction <add>, %53, %cst_17 [1] : vector<8x48xf32> to vector<8xf32>
    %55 = vector.shape_cast %54 : vector<8xf32> to vector<8x1xf32>
    %cst_18 = arith.constant 0.020833334 : f32
    %56 = vector.broadcast %cst_18 : f32 to vector<8x1xf32>
    %57 = arith.mulf %55, %56 : vector<8x1xf32>
    %58 = vector.broadcast %57 : vector<8x1xf32> to vector<8x48xf32>
    %59 = arith.subf %53, %58 : vector<8x48xf32>
    %60 = arith.mulf %59, %59 : vector<8x48xf32>
    %cst_19 = arith.constant dense<0.000000e+00> : vector<8xf32>
    %61 = vector.multi_reduction <add>, %60, %cst_19 [1] : vector<8x48xf32> to vector<8xf32>
    %62 = vector.shape_cast %61 : vector<8xf32> to vector<8x1xf32>
    %cst_20 = arith.constant 0.020833334 : f32
    %63 = vector.broadcast %cst_20 : f32 to vector<8x1xf32>
    %64 = arith.mulf %62, %63 : vector<8x1xf32>
    %cst_21 = arith.constant 9.99999974E-6 : f32
    %65 = vector.broadcast %cst_21 : f32 to vector<8x1xf32>
    %66 = arith.addf %64, %65 : vector<8x1xf32>
    %67 = math.rsqrt %66 : vector<8x1xf32>
    %68 = vector.shape_cast %67 : vector<8x1xf32> to vector<8x1xf32>
    %69 = vector.broadcast %68 : vector<8x1xf32> to vector<8x48xf32>
    %70 = vector.extract_strided_slice %0 {offsets = [0, 192], sizes = [8, 48], strides = [1, 1]} : vector<8x384xf32> to vector<8x48xf32>
    %cst_22 = arith.constant dense<0.000000e+00> : vector<8xf32>
    %71 = vector.multi_reduction <add>, %70, %cst_22 [1] : vector<8x48xf32> to vector<8xf32>
    %72 = vector.shape_cast %71 : vector<8xf32> to vector<8x1xf32>
    %cst_23 = arith.constant 0.020833334 : f32
    %73 = vector.broadcast %cst_23 : f32 to vector<8x1xf32>
    %74 = arith.mulf %72, %73 : vector<8x1xf32>
    %75 = vector.broadcast %74 : vector<8x1xf32> to vector<8x48xf32>
    %76 = arith.subf %70, %75 : vector<8x48xf32>
    %77 = arith.mulf %76, %76 : vector<8x48xf32>
    %cst_24 = arith.constant dense<0.000000e+00> : vector<8xf32>
    %78 = vector.multi_reduction <add>, %77, %cst_24 [1] : vector<8x48xf32> to vector<8xf32>
    %79 = vector.shape_cast %78 : vector<8xf32> to vector<8x1xf32>
    %cst_25 = arith.constant 0.020833334 : f32
    %80 = vector.broadcast %cst_25 : f32 to vector<8x1xf32>
    %81 = arith.mulf %79, %80 : vector<8x1xf32>
    %cst_26 = arith.constant 9.99999974E-6 : f32
    %82 = vector.broadcast %cst_26 : f32 to vector<8x1xf32>
    %83 = arith.addf %81, %82 : vector<8x1xf32>
    %84 = math.rsqrt %83 : vector<8x1xf32>
    %85 = vector.shape_cast %84 : vector<8x1xf32> to vector<8x1xf32>
    %86 = vector.broadcast %85 : vector<8x1xf32> to vector<8x48xf32>
    %87 = vector.extract_strided_slice %0 {offsets = [0, 240], sizes = [8, 48], strides = [1, 1]} : vector<8x384xf32> to vector<8x48xf32>
    %cst_27 = arith.constant dense<0.000000e+00> : vector<8xf32>
    %88 = vector.multi_reduction <add>, %87, %cst_27 [1] : vector<8x48xf32> to vector<8xf32>
    %89 = vector.shape_cast %88 : vector<8xf32> to vector<8x1xf32>
    %cst_28 = arith.constant 0.020833334 : f32
    %90 = vector.broadcast %cst_28 : f32 to vector<8x1xf32>
    %91 = arith.mulf %89, %90 : vector<8x1xf32>
    %92 = vector.broadcast %91 : vector<8x1xf32> to vector<8x48xf32>
    %93 = arith.subf %87, %92 : vector<8x48xf32>
    %94 = arith.mulf %93, %93 : vector<8x48xf32>
    %cst_29 = arith.constant dense<0.000000e+00> : vector<8xf32>
    %95 = vector.multi_reduction <add>, %94, %cst_29 [1] : vector<8x48xf32> to vector<8xf32>
    %96 = vector.shape_cast %95 : vector<8xf32> to vector<8x1xf32>
    %cst_30 = arith.constant 0.020833334 : f32
    %97 = vector.broadcast %cst_30 : f32 to vector<8x1xf32>
    %98 = arith.mulf %96, %97 : vector<8x1xf32>
    %cst_31 = arith.constant 9.99999974E-6 : f32
    %99 = vector.broadcast %cst_31 : f32 to vector<8x1xf32>
    %100 = arith.addf %98, %99 : vector<8x1xf32>
    %101 = math.rsqrt %100 : vector<8x1xf32>
    %102 = vector.shape_cast %101 : vector<8x1xf32> to vector<8x1xf32>
    %103 = vector.broadcast %102 : vector<8x1xf32> to vector<8x48xf32>
    %104 = vector.extract_strided_slice %0 {offsets = [0, 288], sizes = [8, 48], strides = [1, 1]} : vector<8x384xf32> to vector<8x48xf32>
    %cst_32 = arith.constant dense<0.000000e+00> : vector<8xf32>
    %105 = vector.multi_reduction <add>, %104, %cst_32 [1] : vector<8x48xf32> to vector<8xf32>
    %106 = vector.shape_cast %105 : vector<8xf32> to vector<8x1xf32>
    %cst_33 = arith.constant 0.020833334 : f32
    %107 = vector.broadcast %cst_33 : f32 to vector<8x1xf32>
    %108 = arith.mulf %106, %107 : vector<8x1xf32>
    %109 = vector.broadcast %108 : vector<8x1xf32> to vector<8x48xf32>
    %110 = arith.subf %104, %109 : vector<8x48xf32>
    %111 = arith.mulf %110, %110 : vector<8x48xf32>
    %cst_34 = arith.constant dense<0.000000e+00> : vector<8xf32>
    %112 = vector.multi_reduction <add>, %111, %cst_34 [1] : vector<8x48xf32> to vector<8xf32>
    %113 = vector.shape_cast %112 : vector<8xf32> to vector<8x1xf32>
    %cst_35 = arith.constant 0.020833334 : f32
    %114 = vector.broadcast %cst_35 : f32 to vector<8x1xf32>
    %115 = arith.mulf %113, %114 : vector<8x1xf32>
    %cst_36 = arith.constant 9.99999974E-6 : f32
    %116 = vector.broadcast %cst_36 : f32 to vector<8x1xf32>
    %117 = arith.addf %115, %116 : vector<8x1xf32>
    %118 = math.rsqrt %117 : vector<8x1xf32>
    %119 = vector.shape_cast %118 : vector<8x1xf32> to vector<8x1xf32>
    %120 = vector.broadcast %119 : vector<8x1xf32> to vector<8x48xf32>
    %121 = vector.extract_strided_slice %0 {offsets = [0, 336], sizes = [8, 48], strides = [1, 1]} : vector<8x384xf32> to vector<8x48xf32>
    %cst_37 = arith.constant dense<0.000000e+00> : vector<8xf32>
    %122 = vector.multi_reduction <add>, %121, %cst_37 [1] : vector<8x48xf32> to vector<8xf32>
    %123 = vector.shape_cast %122 : vector<8xf32> to vector<8x1xf32>
    %cst_38 = arith.constant 0.020833334 : f32
    %124 = vector.broadcast %cst_38 : f32 to vector<8x1xf32>
    %125 = arith.mulf %123, %124 : vector<8x1xf32>
    %126 = vector.broadcast %125 : vector<8x1xf32> to vector<8x48xf32>
    %127 = arith.subf %121, %126 : vector<8x48xf32>
    %128 = arith.mulf %127, %127 : vector<8x48xf32>
    %cst_39 = arith.constant dense<0.000000e+00> : vector<8xf32>
    %129 = vector.multi_reduction <add>, %128, %cst_39 [1] : vector<8x48xf32> to vector<8xf32>
    %130 = vector.shape_cast %129 : vector<8xf32> to vector<8x1xf32>
    %cst_40 = arith.constant 0.020833334 : f32
    %131 = vector.broadcast %cst_40 : f32 to vector<8x1xf32>
    %132 = arith.mulf %130, %131 : vector<8x1xf32>
    %cst_41 = arith.constant 9.99999974E-6 : f32
    %133 = vector.broadcast %cst_41 : f32 to vector<8x1xf32>
    %134 = arith.addf %132, %133 : vector<8x1xf32>
    %135 = math.rsqrt %134 : vector<8x1xf32>
    %136 = vector.shape_cast %135 : vector<8x1xf32> to vector<8x1xf32>
    %137 = vector.broadcast %136 : vector<8x1xf32> to vector<8x48xf32>
    %138 = tpu.concatenate %18, %35, %52, %69, %86, %103, %120, %137 in 1 : vector<8x48xf32>, vector<8x48xf32>, vector<8x48xf32>, vector<8x48xf32>, vector<8x48xf32>, vector<8x48xf32>, vector<8x48xf32>, vector<8x48xf32> -> vector<8x384xf32>
    %139 = arith.mulf %0, %138 : vector<8x384xf32>
    %140 = vector.broadcast %1 : vector<1x384xf32> to vector<8x384xf32>
    %141 = arith.mulf %139, %140 : vector<8x384xf32>
    %c0_42 = arith.constant 0 : index
    %c0_43 = arith.constant 0 : index
    %142 = vector.load %arg3[%c0_42, %c0_43] : memref<8x384xf32, #tpu.memory_space<vmem>>, vector<8x384xf32>
    tpu.vector_store %arg3[%c0_42, %c0_43], %141 {strides = array<i32>} : memref<8x384xf32, #tpu.memory_space<vmem>>, vector<8x384xf32>,
    return
  }
  func.func @transform_0(%arg0: i32) -> (i32, i32) {
    %c0_i32 = arith.constant 0 : i32
    %c0_i32_0 = arith.constant 0 : i32
    return %arg0, %c0_i32 : i32, i32
  }
  func.func @transform_1(%arg0: i32) -> (i32, i32) {
    %c0_i32 = arith.constant 0 : i32
    %c0_i32_0 = arith.constant 0 : i32
    %c0_i32_1 = arith.constant 0 : i32
    return %c0_i32, %c0_i32_0 : i32, i32
  }
  func.func @transform_2(%arg0: i32) -> (i32, i32) {
    %c0_i32 = arith.constant 0 : i32
    %c0_i32_0 = arith.constant 0 : i32
    return %arg0, %c0_i32 : i32, i32
  }
}

</mosaic_0001>

<bundles_post_ra>
// kernel: tpu_custom_call.1
= control target key start
LH: loop header
LB: loop body
LE: loop exit
PB: predicated region body
PF: predicated region fallthrough
CT: control target
= control target key end

     0   :  { %7 = vsyncpa [#allocation3], 0  ;;  %s895_s0 = inlined_call_operand.hbm [shape: f32[16,384], index: 0, kind: input, shape index: {}]   ;;  %s896_s1 = inlined_call_operand.vmem [shape: f32[1,384], index: 1, kind: input, shape index: {}]   ;;  %s897_s2 = inlined_call_operand.hbm [shape: f32[16,384], index: 2, kind: output, shape index: {}]  }
   0x1   :  { %9 = vsyncpa [#allocation3 + $0x1], 0 }
   0x2   :  { %10 = vsyncpa [#allocation4], 0 }
   0x3   :  { %12 = vsyncpa [#allocation4 + $0x1], 0  ;;  %s657_s9 = smov 0   ;;  %s659_s10 = smov 0  }
   0x4   :  { %s661_s11 = smov 0   ;;  %s663_s12 = smov 0  }
   0x5 LB: > { %s678_s13 = sadd.s32 4294967295, %s631_s12   ;;  %s454_s14 = sadd.s32 4294967294, %s631_s12   ;;  %s631_s12 = sphi %s663_s12, %s911_s12   ;;  %s627_s11 = sphi %s661_s11, %s910_s11   ;;  %s623_s10 = sphi %s659_s10, %s909_s10   ;;  %s619_s9 = sphi %s657_s9, %s908_s9  }
   0x6   : > { %s682_s15 = sadd.s32 1, %s631_s12   ;;  %s25_s16 = sadd.s32 1, %s627_s11 }
   0x7   : > { %s22_s17 = ssub.s32 %s631_s12, %s682_s15  ;;  %p32_p0 = scmp.ne.s32.totalorder %s627_s11, %s623_s10 }
   0x8   : > { %p23_p1 = scmp.eq.s32.totalorder %s22_s17, 0  ;;  %p33_p2 = scmp.eq.s32.totalorder %s631_s12, 0 }
   0x9   : > { %p38_p3 = scmp.ne.s32.totalorder %s623_s10, %s619_s9  ;;  %p39_p4 = scmp.eq.s32.totalorder %s678_s13, 0 }
   0xa   : > { %s694_s18 = scalar_select %p23_p1, %s627_s11, %s25_s16  }
   0xb   : > { %p34_p5 = por %p33_p2, %p32_p0  ;;  %p696_p6 = por %p39_p4, %p38_p3 }
   0xc   : > { %p83_p7 = scmp.eq.s32.totalorder %s678_s13, 1  ;;  %p89_p8 = scmp.eq.s32.totalorder %s454_s14, 1 }
   0xd   : > { %p478_p10 = scmp.lt.s32.totalorder %s631_s12, 2  ;;  %s112_s22 = sand.u32 1, %s627_s11  }
   0xe   : > { %p703_p11 = por %p83_p7, %p32_p0  ;;  %p707_p12 = por %p89_p8, %p38_p3 }
   0xf   : > { %s463_s23 = smul.u32 384, %s631_s12  ;;  %p718_p13 = pnand %p478_p10, %p34_p5 }
  0x10   : > { %s900_s20 = scalar_select %p703_p11, 1, 0 }
  0x11   : > { %s901_s21 = scalar_select %p707_p12, 1, 0 }
  0x12   : > { %s462_s24 = smul.u32 24, %s112_s22  ;;  %s716_s27 = scalar_lea.hbm %s895_s0, %s463_s23 }
  0x13   : > { %s113_s3 = scalar_lea.sflag [#allocation3], %s112_s22  ;;  %s535_s4 = scalar_lea.hbm %s716_s27, 384 }
  0x14   : > { %s116_s29 = scalar_lea.vmem [#allocation2], %s462_s24  ;;  %p536_p2 = scmp.ne.s32.totalorder %s716_s27, %s535_s4 }
  0x15   : > { %s124_s30 = sshll.u32 %s116_s29, 4  ;;  %p537_p3 = pneg %p718_p13  ;;  %s723_s30 = int_to_ptr.vmem [resolvable:$true] %s124_s30 }
  0x16   : > { %s540_s7 = scalar_lea.hbm %s895_s0, 768  ;;  %p541_p7 = scmp.lt.u32.totalorder %s716_s27, %s895_s0 }
  0x17   : > { %p538_p4 = pnand %p537_p3, %p536_p2  ;;  %p542_p8 = scmp.lt.u32.totalorder %s540_s7, %s535_s4 }
  0x18   : > { %p544_p9 = scmp.lt.u32.totalorder %s535_s4, %s716_s27 }
  0x19   : > { %p539_p5 = pneg %p538_p4  ;;  %p543_p10 = por %p542_p8, %p541_p7 }
  0x1b   : > { %p545_p0 = por %p544_p9, %p543_p10 }
  0x1d   : > { %p546_p1 = pnand %p545_p0, %p539_p5 }
  0x1f   : > { %549 = shalt.err (!%p546_p1)
}
  0x20   : > { %s550_s16 = scalar_lea.vmem %s723_s30, 384  ;;  %s633_s17 = smov [#allocation2]  }
  0x21   : > { %p551_p2 = scmp.ne.s32.totalorder %s723_s30, %s550_s16  ;;  %s555_s22 = sshll.u32 %s633_s17, 4  ;;  %s556_s22 = int_to_ptr.vmem [resolvable:$false] %s555_s22 }
  0x22   : > { %s557_s23 = scalar_lea.vmem %s556_s22, 768  ;;  %p558_p11 = scmp.lt.s32.totalorder %s723_s30, %s556_s22 }
  0x23   : > { %p553_p4 = pnand %p551_p2, %p537_p3  ;;  %p559_p7 = scmp.lt.s32.totalorder %s557_s23, %s550_s16 }
  0x25   : > { %p554_p12 = pneg %p553_p4  ;;  %p560_p8 = por %p559_p7, %p558_p11 }
  0x27   : > { %p561_p9 = pnand %p560_p8, %p554_p12 }
  0x29   : > { %564 = shalt.err (!%p561_p9)
}
  0x2a   : > { %473 = dma.hbm_to_vmem [thread:$0]  (!%p718_p13), %s716_s27, 384, %s723_s30, %s113_s3  }
  0x2b   : > { %p903_p0 = scmp.lt.s32.totalorder %s631_s12, 3  ;;  %p904_p1 = scmp.ge.s32.totalorder %s631_s12, 1 }
  0x2d   : > { %p130_p3 = pnand %p904_p1, %p903_p0 }
  0x2e   : > { %s756_s24 = sand.u32 (!%p130_p3), 1, %s623_s10  }
  0x2f   : > { %133 = sbr.rel (%p130_p3) target bundleno = 773 (0x305), region = 28  ;;  %s136_s26 = scalar_lea.sflag (!%p130_p3), [#allocation3], %s756_s24 }
  0x30   : > { %s464_s25 = smul.u32 (!%p130_p3), 24, %s756_s24 }
  0x32   : > { %s139_s28 = scalar_lea.vmem (!%p130_p3), [#allocation2], %s464_s25 }
  0x36   : > { %610 = dma.done.wait (%p696_p6), %s136_s26, 384  }
  0x37   : > { %612 = vsyncadd (%p696_p6), %s136_s26, 4294966912  ;;  %vm164_vm0 = vcmask 392192   ;;  %v766_v0 = vld [vmem:[%s139_s28] sm:$0xff]  ;;  %s634_s27 = smov 80   ;;  %s635_s29 = smov 32   ;;  %v774_v2 = vld [vmem:[%s139_s28 + $0x8] sm:$0xff] }
  0x38   : > { %178 = vrot.lane.b32.xlu1 %v766_v0, %s634_s27  ;;  %v165_v1 = vsel %vm164_vm0, %v766_v0, 0.0  ;;  %v778_v3 = vld [vmem:[%s139_s28 + $0x10] sm:$0xff]  ;;  %s636_s19 = smov 16   ;;  %s637_s30 = smov 112   ;;  %vm202_vm1 = vcmask 261120   ;;  %vm270_vm2 = vcmask 130048  }
  0x39   : > { %166 = vadd.xlane.f32.xlu0 %v165_v1  ;;  %s638_s3 = smov 64   ;;  %s639_s4 = smov 96   ;;  %vm334_vm3 = vcmask 785408   ;;  %vm337_vm4 = vcmask 523264   ;;  %vm339_vm5 = vcmask 916480   ;;  %vm342_vm6 = vcmask 654336  }
  0x3a   : > { %s640_s5 = smov 48   ;;  %s837_s8 = scalar_lea.vmem [#allocation5], %s464_s25 }
  0x3b   : > { %s465_s14 = smul.u32 384, %s678_s13  ;;  %s384_s16 = sshll.u32 %s837_s8, 4  ;;  %s852_s16 = int_to_ptr.vmem [resolvable:$true] %s384_s16 }
  0x3c   : > { %198 = vrot.lane.b32.xlu1 %v766_v0, %s635_s29  ;;  %s370_s25 = scalar_lea.sflag [#allocation4], %s756_s24  ;;  %s565_s26 = scalar_lea.vmem %s852_s16, 384 }
  0x3d   : > { %s850_s23 = scalar_lea.hbm %s897_s2, %s465_s14  ;;  %p566_p6 = scmp.ne.s32.totalorder %s852_s16, %s565_s26 }
  0x3e   : > { %p905_p11 = scmp.ne.s32.totalorder %s900_s20, 0  ;;  %s641_s13 = smov [#allocation5]  }
  0x3f   : > { %s569_s28 = sshll.u32 %s641_s13, 4  ;;  %s570_s28 = int_to_ptr.vmem [resolvable:$false] %s569_s28 }
  0x40   : > { %200 = vrot.lane.b32.xlu1 %v774_v2, %s635_s29  ;;  %p567_p12 = pnand %p566_p6, %p905_p11  ;;  %p572_p5 = scmp.lt.s32.totalorder %s852_s16, %s570_s28 }
  0x42   : > { %p568_p13 = pneg %p567_p12 }
  0x44   : > { %268 = vrot.lane.b32.xlu1 %v778_v3, %s636_s19 }
  0x48   : > { %227 = vrot.lane.b32.xlu1 %v774_v2, %s637_s30 }
  0x4c   : > { %246 = vrot.lane.b32.xlu1 %v774_v2, %s638_s3 }
  0x4f   : > { %266 = vrot.lane.b32.xlu0 %v774_v2, %s636_s19 }
  0x50   : > { %295 = vrot.lane.b32.xlu1 %v778_v3, %s639_s4 }
  0x54   : > { %314 = vrot.lane.b32.xlu1 %v778_v3, %s640_s5 }
  0xaa   : > { %v179_v4 = vpop.permute.xlu1 %178 }
  0xab   : > { %v181_v5 = vsel %vm164_vm0, %v179_v4, 0.0 }
  0xac   : > { %182 = vadd.xlane.f32.xlu1 %v181_v5 }
  0xae   : > { %v199_v6 = vpop.permute.xlu1 %198 }
  0xb2   : > { %v201_v7 = vpop.permute.xlu1 %200 }
  0xb3   : > { %v203_v8 = vsel %vm202_vm1, %v199_v6, %v201_v7 }
  0xb4   : > { %v205_v9 = vsel %vm164_vm0, %v203_v8, 0.0 }
  0xb5   : > { %206 = vadd.xlane.f32.xlu0 %v205_v9 }
  0xb6   : > { %v269_v10 = vpop.permute.xlu1 %268 }
  0xba   : > { %v228_v11 = vpop.permute.xlu1 %227 }
  0xbb   : > { %v230_v12 = vsel %vm164_vm0, %v228_v11, 0.0 }
  0xbc   : > { %231 = vadd.xlane.f32.xlu1 %v230_v12 }
  0xbe   : > { %v247_v13 = vpop.permute.xlu1 %246 }
  0xbf   : > { %v249_v14 = vsel %vm164_vm0, %v247_v13, 0.0 }
  0xc0   : > { %250 = vadd.xlane.f32.xlu1 %v249_v14 }
  0xc2   : > { %v296_v15 = vpop.permute.xlu1 %295 }
  0xc3   : > { %v298_v26 = vsel %vm164_vm0, %v296_v15, 0.0 }
  0xc6   : > { %v167_v16 = vpop.xlane.xlu0 %166  ;;  %v315_v17 = vpop.permute.xlu1 %314 }
  0xc7   : > { %v168_v18 = vmul.f32 0.020833334, %v167_v16  ;;  %v317_v19 = vsel %vm164_vm0, %v315_v17, 0.0 }
  0xc8   : > { %318 = vadd.xlane.f32.xlu0 %v317_v19 }
  0xc9   : > { %v169_v20 = vsub.f32 %v766_v0, %v168_v18 }
  0xca   : > { %v267_v21 = vpop.permute.xlu0 %266 }
  0xcb   : > { %v271_v22 = vsel %vm270_vm2, %v267_v21, %v269_v10  ;;  %v170_v23 = vmul.f32 %v169_v20, %v169_v20 }
  0xcc   : > { %v273_v24 = vsel %vm164_vm0, %v271_v22, 0.0 }
  0xcd   : > { %274 = vadd.xlane.f32.xlu1 %v273_v24  ;;  %v171_v25 = vsel %vm164_vm0, %v170_v23, 0.0  ;;  %v348_v23 = vlaneseq }
  0xce   : > { %172 = vadd.xlane.f32.xlu0 %v171_v25 }
  0xd1   : > { %299 = vadd.xlane.f32.xlu1 %v298_v26  ;;  %v349_v26 = vshrl.u32 %v348_v23, 7 }
 0x139   : > { %v183_v27 = vpop.xlane.xlu1 %182 }
 0x13a   : > { %v184_v28 = vmul.f32 0.020833334, %v183_v27  ;;  %v350_v27 = vsub.s32 0, %v349_v26 }
 0x13c   : > { %v185_v29 = vsub.f32 %v766_v0, %v184_v28 }
 0x13e   : > { %v186_v30 = vmul.f32 %v185_v29, %v185_v29  ;;  %v163_v29 = vld [vmem:[%s896_s1] sm:$0x7] }
 0x140   : > { %188 = vrot.lane.b32.xlu0 %v186_v30, %s634_s27  ;;  %s571_s27 = scalar_lea.vmem %s570_s28, 768 }
 0x141   : > { %p573_p10 = scmp.lt.s32.totalorder %s571_s27, %s565_s26 }
 0x142   : > { %v207_v31 = vpop.xlane.xlu0 %206 }
 0x143   : > { %v208_v32 = vmul.f32 0.020833334, %v207_v31  ;;  %p574_p2 = por %p573_p10, %p572_p5 }
 0x145   : > { %v209_v33 = vsub.f32 %v766_v0, %v208_v32  ;;  %v210_v34 = vsub.f32 %v774_v2, %v208_v32  ;;  %p575_p4 = pnand %p574_p2, %p568_p13 }
 0x147   : > { %v211_v35 = vmul.f32 %v209_v33, %v209_v33  ;;  %v212_v38 = vmul.f32 %v210_v34, %v210_v34  ;;  %v351_v33 = vrot.slane %v163_v29, %v350_v27 }
 0x149   : > { %v232_v36 = vpop.xlane.xlu1 %231  ;;  %215 = vrot.lane.b32.xlu1 %v211_v35, %s635_s29 }
 0x14a   : > { %v233_v37 = vmul.f32 0.020833334, %v232_v36 }
 0x14c   : > { %v234_v39 = vsub.f32 %v774_v2, %v233_v37 }
 0x14d   : > { %v251_v40 = vpop.xlane.xlu1 %250  ;;  %217 = vrot.lane.b32.xlu1 %v212_v38, %s635_s29 }
 0x14e   : > { %v235_v41 = vmul.f32 %v234_v39, %v234_v39  ;;  %v252_v42 = vmul.f32 0.020833334, %v251_v40 }
 0x150   : > { %v253_v43 = vsub.f32 %v774_v2, %v252_v42  ;;  %237 = vrot.lane.b32.xlu0 %v235_v41, %s637_s30 }
 0x152   : > { %v254_v44 = vmul.f32 %v253_v43, %v253_v43 }
 0x154   : > { %256 = vrot.lane.b32.xlu1 %v254_v44, %s638_s3 }
 0x155   : > { %v319_v55 = vpop.xlane.xlu0 %318 }
 0x156   : > { %v320_v6 = vmul.f32 0.020833334, %v319_v55 }
 0x158   : > { %v321_v7 = vsub.f32 %v778_v3, %v320_v6 }
 0x15a   : > { %v275_v45 = vpop.xlane.xlu1 %274  ;;  %v322_v8 = vmul.f32 %v321_v7, %v321_v7 }
 0x15b   : > { %v276_v46 = vmul.f32 0.020833334, %v275_v45  ;;  %v173_v56 = vpop.xlane.xlu0 %172 }
 0x15c   : > { %v174_v17 = vmul.f32 0.020833334, %v173_v56 }
 0x15d   : > { %v277_v49 = vsub.f32 %v774_v2, %v276_v46  ;;  %v278_v52 = vsub.f32 %v778_v3, %v276_v46 }
 0x15e   : > { %v300_v47 = vpop.xlane.xlu1 %299  ;;  %v175_v19 = vadd.f32 1e-05, %v174_v17 }
 0x15f   : > { %v301_v48 = vmul.f32 0.020833334, %v300_v47  ;;  %v279_v53 = vmul.f32 %v277_v49, %v277_v49  ;;  %v280_v54 = vmul.f32 %v278_v52, %v278_v52  ;;  %v354_v49 = vsub.s32 1, %v349_v26 }
 0x161   : > { %v302_v50 = vsub.f32 %v778_v3, %v301_v48  ;;  %v355_v55 = vrot.slane %v163_v29, %v354_v49 }
 0x163   : > { %v303_v51 = vmul.f32 %v302_v50, %v302_v50 }
 0x165   : > { %305 = vrot.lane.b32.xlu0 %v303_v51, %s639_s4 }
 0x169   : > { %283 = vrot.lane.b32.xlu0 %v279_v53, %s636_s19 }
 0x16d   : > { %285 = vrot.lane.b32.xlu0 %v280_v54, %s636_s19 }
 0x1b2   : > { %v189_v57 = vpop.permute.xlu0 %188 }
 0x1b3   : > { %v191_v58 = vsel %vm164_vm0, %v189_v57, 0.0 }
 0x1b4   : > { %192 = vadd.xlane.f32.xlu0 %v191_v58 }
 0x1bb   : > { %v216_v59 = vpop.permute.xlu1 %215 }
 0x1bf   : > { %v218_v60 = vpop.permute.xlu1 %217 }
 0x1c0   : > { %v219_v61 = vsel %vm202_vm1, %v216_v59, %v218_v60 }
 0x1c1   : > { %v221_v62 = vsel %vm164_vm0, %v219_v61, 0.0 }
 0x1c2   : > { %222 = vadd.xlane.f32.xlu0 %v221_v62  ;;  %v238_v63 = vpop.permute.xlu0 %237 }
 0x1c3   : > { %v240_v1 = vsel %vm164_vm0, %v238_v63, 0.0  ;;  %v358_v63 = vsub.s32 2, %v349_v26 }
 0x1c4   : > { %241 = vadd.xlane.f32.xlu1 %v240_v1 }
 0x1c6   : > { %v257_v4 = vpop.permute.xlu1 %256 }
 0x1c7   : > { %v259_v5 = vsel %vm164_vm0, %v257_v4, 0.0  ;;  %v359_v4 = vrot.slane %v163_v29, %v358_v63 }
 0x1c8   : > { %260 = vadd.xlane.f32.xlu1 %v259_v5 }
 0x1d7   : > { %v306_v9 = vpop.permute.xlu0 %305 }
 0x1d8   : > { %324 = vrot.lane.b32.xlu0 %v322_v8, %s640_s5  ;;  %v308_v10 = vsel %vm164_vm0, %v306_v9, 0.0 }
 0x1d9   : > { %309 = vadd.xlane.f32.xlu1 %v308_v10 }
 0x1db   : > { %v284_v11 = vpop.permute.xlu0 %283 }
 0x1df   : > { %v286_v12 = vpop.permute.xlu0 %285 }
 0x1e0   : > { %v287_v13 = vsel %vm270_vm2, %v284_v11, %v286_v12 }
 0x1e1   : > { %v289_v14 = vsel %vm164_vm0, %v287_v13, 0.0 }
 0x1e2   : > { %290 = vadd.xlane.f32.xlu1 %v289_v14 }
 0x241   : > { %v193_v15 = vpop.xlane.xlu0 %192 }
 0x242   : > { %v194_v16 = vmul.f32 0.020833334, %v193_v15 }
 0x244   : > { %v195_v18 = vadd.f32 1e-05, %v194_v16 }
 0x246   : > { %519 = vrsqrt.f32 %v195_v18 }
 0x247   : > { %521 = vrsqrt.f32 %v175_v19 }
 0x24f   : > { %v223_v20 = vpop.xlane.xlu0 %222 }
 0x250   : > { %v224_v21 = vmul.f32 0.020833334, %v223_v20  ;;  %v520_v28 = vpop.eup %519 }
 0x251   : > { %v522_v30 = vpop.eup %521  ;;  %v242_v34 = vpop.xlane.xlu1 %241 }
 0x252   : > { %v225_v22 = vadd.f32 1e-05, %v224_v21  ;;  %v333_v32 = vsel %vm164_vm0, %v522_v30, %v520_v28  ;;  %v243_v39 = vmul.f32 0.020833334, %v242_v34 }
 0x253   : > { %v325_v24 = vpop.permute.xlu0 %324 }
 0x254   : > { %523 = vrsqrt.f32 %v225_v22  ;;  %v327_v25 = vsel %vm164_vm0, %v325_v24, 0.0  ;;  %v244_v43 = vadd.f32 1e-05, %v243_v39 }
 0x255   : > { %328 = vadd.xlane.f32.xlu1 %v327_v25  ;;  %v261_v38 = vpop.xlane.xlu1 %260 }
 0x256   : > { %v262_v40 = vmul.f32 0.020833334, %v261_v38  ;;  %525 = vrsqrt.f32 %v244_v43 }
 0x258   : > { %v263_v44 = vadd.f32 1e-05, %v262_v40 }
 0x25a   : > { %527 = vrsqrt.f32 %v263_v44 }
 0x25e   : > { %v524_v31 = vpop.eup %523 }
 0x25f   : > { %v335_v35 = vsel %vm334_vm3, %v333_v32, %v524_v31 }
 0x260   : > { %v344_v36 = vmul.f32 %v335_v35, %v766_v0  ;;  %v526_v48 = vpop.eup %525 }
 0x261   : > { %v336_v52 = vsel %vm270_vm2, %v524_v31, %v526_v48 }
 0x262   : > { %v363_v37 = vmul.f32 %v351_v33, %v344_v36 }
 0x264   : > { %366 = vst [vmem:[%s837_s8] sm:$0xff] %v363_v37  ;;  %v528_v50 = vpop.eup %527 }
 0x265   : > { %v338_v54 = vsel %vm337_vm4, %v336_v52, %v528_v50 }
 0x266   : > { %v310_v41 = vpop.xlane.xlu1 %309 }
 0x267   : > { %v311_v42 = vmul.f32 0.020833334, %v310_v41 }
 0x269   : > { %v312_v45 = vadd.f32 1e-05, %v311_v42 }
 0x26b   : > { %529 = vrsqrt.f32 %v312_v45 }
 0x26f   : > { %v291_v46 = vpop.xlane.xlu1 %290 }
 0x270   : > { %v292_v47 = vmul.f32 0.020833334, %v291_v46 }
 0x272   : > { %v293_v0 = vadd.f32 1e-05, %v292_v47 }
 0x274   : > { %531 = vrsqrt.f32 %v293_v0 }
 0x275   : > { %v530_v51 = vpop.eup %529 }
 0x27e   : > { %v532_v53 = vpop.eup %531 }
 0x27f   : > { %v340_v56 = vsel %vm339_vm5, %v338_v54, %v532_v53  ;;  %v341_v57 = vsel %vm202_vm1, %v532_v53, %v530_v51 }
 0x280   : > { %v345_v58 = vmul.f32 %v340_v56, %v774_v2 }
 0x282   : > { %v364_v59 = vmul.f32 %v355_v55, %v345_v58 }
 0x284   : > { %367 = vst [vmem:[%s837_s8 + $0x8] sm:$0xff] %v364_v59 }
 0x2e2   : > { %v329_v60 = vpop.xlane.xlu1 %328 }
 0x2e3   : > { %v330_v61 = vmul.f32 0.020833334, %v329_v60 }
 0x2e5   : > { %v331_v62 = vadd.f32 1e-05, %v330_v61 }
 0x2e7   : > { %533 = vrsqrt.f32 %v331_v62 }
 0x2f1   : > { %v534_v1 = vpop.eup %533 }
 0x2f2   : > { %v343_v5 = vsel %vm342_vm6, %v341_v57, %v534_v1 }
 0x2f3   : > { %v346_v6 = vmul.f32 %v343_v5, %v778_v3 }
 0x2f5   : > { %v365_v7 = vmul.f32 %v359_v4, %v346_v6 }
 0x2f7   : > { %368 = vst [vmem:[%s837_s8 + $0x10] sm:$0xff] %v365_v7 }
 0x2f8   : > { %578 = shalt.err (!%p575_p4)
}
 0x2f9   : > { %s579_s24 = scalar_lea.hbm %s850_s23, 384  ;;  %s583_s30 = scalar_lea.hbm %s897_s2, 768 }
 0x2fa   : > { %p580_p7 = scmp.ne.s32.totalorder %s850_s23, %s579_s24  ;;  %p584_p0 = scmp.lt.u32.totalorder %s850_s23, %s897_s2 }
 0x2fb   : > { %p585_p1 = scmp.lt.u32.totalorder %s583_s30, %s579_s24  ;;  %p587_p6 = scmp.lt.u32.totalorder %s579_s24, %s850_s23 }
 0x2fc   : > { %p581_p8 = pnand %p580_p7, %p905_p11 }
 0x2fd   : > { %p586_p3 = por %p585_p1, %p584_p0 }
 0x2fe   : > { %p582_p9 = pneg %p581_p8 }
 0x2ff   : > { %p588_p12 = por %p587_p6, %p586_p3 }
 0x301   : > { %p589_p13 = pnand %p588_p12, %p582_p9 }
 0x303   : > { %592 = shalt.err (!%p589_p13)
}
 0x304   : > { %468 = dma.vmem_to_hbm [thread:$0]  (%p905_p11), %s852_s16, 384, %s850_s23, %s370_s25  }
 0x305 PF: > { %s396_s5 = sand.u32 1, %s619_s9   ;;  %p906_p5 = scmp.ne.s32.totalorder %s901_s21, 0 }
 0x306   : > { %p907_p10 = scmp.ge.s32.totalorder %s631_s12, 2  ;;  %s397_s6 = scalar_lea.sflag [#allocation4], %s396_s5 }
 0x308   : > { %p475_p2 = pnand %p907_p10, %p906_p5 }
 0x30a   : > { %614 = dma.done.wait (!%p475_p2), %s397_s6, 384  }
 0x30b   : > { %616 = vsyncadd (!%p475_p2), %s397_s6, 4294966912  ;;  %p15_p4 = scmp.ge.s32.totalorder %s682_s15, 4   ;;  %s908_s9 = smov %s623_s10 }
 0x30c   : > { %s909_s10 = smov %s627_s11  ;;  %s910_s11 = smov %s694_s18 }
 0x30d   : > { %s911_s12 = smov %s682_s15  ;;  %17 = sbr.rel (!%p15_p4) target bundleno = 5 (0x5), region = 73 }
 0x314   :  { %402 = vsyncpa [#allocation3], 1 }
 0x315   :  { %404 = vsyncpa [#allocation3 + $0x1], 1 }
 0x316   :  { %405 = vsyncpa [#allocation4], 1 }
 0x317   :  { %407 = vsyncpa [#allocation4 + $0x1], 1 }

</bundles_post_ra>
